<compile_context>
chip_gen: v5e
topology: v5e:2x2
jax: 0.10.0
libtpu: 0.0.40
codegen_flags: <defaults>
</compile_context>

<pallas_src>
import functools

import jax
import jax.numpy as jnp
from jax.experimental import pallas as pl
from jax.experimental.pallas import tpu as pltpu


def _round_up(v, mult):
    return ((v + mult - 1) // mult) * mult


def _glumlp_kernel(*refs, num_layers, hidden, compute_dtype):
    # refs = (x_ref, [w_l, b_l] * num_layers, w_out, b_out, o_ref)
    x_ref = refs[0]
    o_ref = refs[-1]
    p_refs = refs[1:-1]

    h = x_ref[...]                                    # (tm, in_dim), native dtype
    for l in range(num_layers):
        w_ref = p_refs[2 * l]                         # (h_in, 2*hidden)
        b_ref = p_refs[2 * l + 1]                     # (1, 2*hidden) f32
        # One fused MXU matmul per layer, f32 accumulation.
        y = jnp.dot(h, w_ref[...],
                    preferred_element_type=jnp.float32) + b_ref[...]
        a = y[:, :hidden]                             # static lane slices
        g = y[:, hidden:]
        h = (a * jax.nn.sigmoid(g)).astype(compute_dtype)   # GLU (f32 math)
    wo_ref = p_refs[2 * num_layers]                   # (hidden, out_dim)
    bo_ref = p_refs[2 * num_layers + 1]               # (1, out_dim) f32
    out = jnp.dot(h, wo_ref[...],
                  preferred_element_type=jnp.float32) + bo_ref[...]
    o_ref[...] = out.astype(o_ref.dtype)


def glumlp_forward(x, glu_params, out_params, *, tile_m=4096, out_dtype=None):
    """Fused Pallas GLUMLP forward.

    Args:
      x: float array [..., in_dim] (f32 or bf16).
      glu_params: list of (w, b) per GLU layer with the a/gate halves fused:
                  w = torch_W.T with shape (h_in, 2*hidden), b shape (2*hidden,).
                  Column order matches torch's chunk(2, -1): [:hidden] -> a,
                  [hidden:] -> gate.
      out_params: (wo, bo); wo = torch_Wout.T with shape (hidden, out_dim),
                  bo shape (out_dim,).
      tile_m: row tile for the grid (sweep 2048-8192 for large M).
      out_dtype: output dtype; defaults to x.dtype.
    Returns:
      array [..., out_dim] in out_dtype.
    """
    num_layers = len(glu_params)
    orig_shape = x.shape
    in_dim = orig_shape[-1]
    m = 1
    for s in orig_shape[:-1]:
        m *= s
    x2d = jnp.reshape(x, (m, in_dim))

    compute_dtype = x2d.dtype
    out_dtype = compute_dtype if out_dtype is None else jnp.dtype(out_dtype)

    hidden = glu_params[0][0].shape[1] // 2
    wo, bo = out_params
    out_dim = wo.shape[1]

    # --- row tiling: big tiles when M is large; >=2 grid steps for megacore.
    if m >= tile_m:
        tm = tile_m
    elif m <= 8:
        tm = m
    else:
        tm = _round_up(pl.cdiv(m, 2), 8)
    grid = (pl.cdiv(m, tm),)

    # --- operands & specs -----------------------------------------------
    def resident_spec(arr):
        return pl.BlockSpec(arr.shape, lambda i: (0, 0))

    operands = [x2d]
    in_specs = [pl.BlockSpec((tm, in_dim), lambda i: (i, 0))]

    for (w, b) in glu_params:
        b2 = jnp.asarray(b, jnp.float32).reshape(1, -1)
        operands.append(w)
        in_specs.append(resident_spec(w))
        operands.append(b2)
        in_specs.append(resident_spec(b2))

    bo2 = jnp.asarray(bo, jnp.float32).reshape(1, -1)
    operands.append(wo)
    in_specs.append(resident_spec(wo))
    operands.append(bo2)
    in_specs.append(resident_spec(bo2))

    # --- VMEM budget (lane-padded: narrow cols pad to 128 lanes) ----------
    lane = 128

    def pad_cols(c):
        return _round_up(c, lane)

    in_bytes = 2 * tm * pad_cols(in_dim) * x2d.dtype.itemsize       # dbl-buffered
    out_bytes = 2 * tm * pad_cols(out_dim) * jnp.dtype(out_dtype).itemsize
    widest = max([in_dim, out_dim] + [w.shape[1] for (w, _) in glu_params])
    tmp_bytes = 6 * tm * pad_cols(widest) * 4                        # f32 temporaries
    param_bytes = 2 * sum(
        _round_up(a.shape[0], 8) * pad_cols(a.shape[1]) * a.dtype.itemsize
        for a in operands[1:])
    vmem_budget = int(1.3 * (in_bytes + out_bytes + tmp_bytes + param_bytes))
    vmem_limit = min(max(vmem_budget, 16 << 20), 48 << 20)

    # --- cost estimate -----------------------------------------------------
    flops = 0
    transcendentals = 0
    bytes_accessed = (int(x2d.size) * x2d.dtype.itemsize
                      + m * out_dim * jnp.dtype(out_dtype).itemsize)
    h_in = in_dim
    for (w, b) in glu_params:
        n2 = w.shape[1]
        flops += 2 * m * h_in * n2 + 3 * m * n2
        transcendentals += m * (n2 // 2)
        bytes_accessed += int(w.size) * w.dtype.itemsize + int(b.size) * 4
        h_in = n2 // 2
    flops += 2 * m * h_in * out_dim + m * out_dim
    bytes_accessed += int(wo.size) * wo.dtype.itemsize + int(bo.size) * 4
    cost = pl.CostEstimate(flops=flops, transcendentals=transcendentals,
                           bytes_accessed=bytes_accessed)

    kernel = functools.partial(_glumlp_kernel, num_layers=num_layers,
                               hidden=hidden, compute_dtype=compute_dtype)

    out2d = pl.pallas_call(
        kernel,
        out_shape=jax.ShapeDtypeStruct((m, out_dim), out_dtype),
        grid_spec=pltpu.PrefetchScalarGridSpec(
            num_scalar_prefetch=0,
            grid=grid,
            in_specs=in_specs,
            out_specs=pl.BlockSpec((tm, out_dim), lambda i: (i, 0)),
        ),
        compiler_params=pltpu.CompilerParams(
            dimension_semantics=("parallel",),
            vmem_limit_bytes=vmem_limit),
        cost_estimate=cost,
    )(*operands)

    return jnp.reshape(out2d, orig_shape[:-1] + (out_dim,))


def glumlp_ref(x, glu_params, out_params):
    """Plain-JAX reference matching the PyTorch module (f32 math)."""
    h = x.astype(jnp.float32)
    for (w, b) in glu_params:
        y = h @ w.astype(jnp.float32) + b.astype(jnp.float32)
        hid = w.shape[1] // 2
        a, g = y[..., :hid], y[..., hid:]
        h = a * jax.nn.sigmoid(g)
    wo, bo = out_params
    return h @ wo.astype(jnp.float32) + bo.astype(jnp.float32)


if __name__ == "__main__":
    key = jax.random.PRNGKey(0)

    # GLUMLP(input=16, hidden=32, output=16, layers=2); x has (batch=2, seq=8).
    input_dim, hidden, output_dim, layers = 16, 32, 16, 2
    batch, seq = 2, 8

    key, kx = jax.random.split(key)
    x = jax.random.normal(kx, (batch, seq, input_dim), dtype=jnp.float32)

    glu_params = []
    h_in = input_dim
    for _ in range(layers):
        key, kw, kb = jax.random.split(key, 3)
        scale = 1.0 / jnp.sqrt(jnp.float32(h_in))
        # Fused a/gate weight (h_in, 2*hidden) == torch_W.T, bias (2*hidden,).
        w = jax.random.normal(kw, (h_in, 2 * hidden), dtype=jnp.float32) * scale
        b = jax.random.normal(kb, (2 * hidden,), dtype=jnp.float32) * scale
        glu_params.append((w, b))
        h_in = hidden

    key, kwo, kbo = jax.random.split(key, 3)
    scale = 1.0 / jnp.sqrt(jnp.float32(hidden))
    # Mirrors `self.net[-1].weight.mul_(0.01)` in the PyTorch init.
    wo = jax.random.normal(kwo, (hidden, output_dim), dtype=jnp.float32) * scale * 0.01
    bo = jax.random.normal(kbo, (output_dim,), dtype=jnp.float32) * scale
    out_params = (wo, bo)

    out = glumlp_forward(x, glu_params, out_params)
    out = jax.block_until_ready(out)

    ref = glumlp_ref(x, glu_params, out_params)
    assert out.shape == (batch, seq, output_dim), out.shape
    assert jnp.allclose(out.astype(jnp.float32), ref, atol=1e-4, rtol=1e-4), (
        float(jnp.max(jnp.abs(out.astype(jnp.float32) - ref))))

    print("KERNEL_OK")
</pallas_src>

<mosaic_0001>
module attributes {stable_mosaic.version = 11 : i64} {
  func.func @_glumlp_kernel(%arg0: i32, %arg1: memref<8x16xf32, #tpu.memory_space<vmem>>, %arg2: memref<16x64xf32, #tpu.memory_space<vmem>>, %arg3: memref<1x64xf32, #tpu.memory_space<vmem>>, %arg4: memref<32x64xf32, #tpu.memory_space<vmem>>, %arg5: memref<1x64xf32, #tpu.memory_space<vmem>>, %arg6: memref<32x16xf32, #tpu.memory_space<vmem>>, %arg7: memref<1x16xf32, #tpu.memory_space<vmem>>, %arg8: memref<8x16xf32, #tpu.memory_space<vmem>>) attributes {dimension_semantics = [#tpu.dimension_semantics<parallel>], iteration_bounds = array<i64: 2>, scalar_prefetch = 0 : i64, scratch_operands = 0 : i64, tpu.core_type = #tpu.core_type<tc>, window_params = [{transform_indices = @transform_0, window_bounds = array<i64: 8, 16>}, {pipeline_mode = #tpu.pipeline_mode<synchronous>, transform_indices = @transform_1, window_bounds = array<i64: 16, 64>}, {pipeline_mode = #tpu.pipeline_mode<synchronous>, transform_indices = @transform_2, window_bounds = array<i64: 1, 64>}, {pipeline_mode = #tpu.pipeline_mode<synchronous>, transform_indices = @transform_3, window_bounds = array<i64: 32, 64>}, {pipeline_mode = #tpu.pipeline_mode<synchronous>, transform_indices = @transform_4, window_bounds = array<i64: 1, 64>}, {pipeline_mode = #tpu.pipeline_mode<synchronous>, transform_indices = @transform_5, window_bounds = array<i64: 32, 16>}, {pipeline_mode = #tpu.pipeline_mode<synchronous>, transform_indices = @transform_6, window_bounds = array<i64: 1, 16>}, {transform_indices = @transform_7, window_bounds = array<i64: 8, 16>}]} {
    %c0 = arith.constant 0 : index
    %c0_0 = arith.constant 0 : index
    %0 = vector.load %arg1[%c0, %c0_0] : memref<8x16xf32, #tpu.memory_space<vmem>>, vector<8x16xf32>
    %c0_1 = arith.constant 0 : index
    %c0_2 = arith.constant 0 : index
    %1 = vector.load %arg2[%c0_1, %c0_2] : memref<16x64xf32, #tpu.memory_space<vmem>>, vector<16x64xf32>
    %cst = arith.constant dense<0.000000e+00> : vector<8x64xf32>
    %2 = tpu.matmul %0, %1, %cst {dimension_numbers = #tpu.dot_dimension_numbers<[1], [0], [0], [1], [0, 0, 1, 1], [], []>} : vector<8x16xf32>, vector<16x64xf32>, vector<8x64xf32> -> vector<8x64xf32>
    %c0_3 = arith.constant 0 : index
    %c0_4 = arith.constant 0 : index
    %3 = vector.load %arg3[%c0_3, %c0_4] : memref<1x64xf32, #tpu.memory_space<vmem>>, vector<1x64xf32>
    %4 = vector.broadcast %3 : vector<1x64xf32> to vector<8x64xf32>
    %5 = arith.addf %2, %4 : vector<8x64xf32>
    %6 = vector.extract_strided_slice %5 {offsets = [0, 0], sizes = [8, 32], strides = [1, 1]} : vector<8x64xf32> to vector<8x32xf32>
    %7 = vector.extract_strided_slice %5 {offsets = [0, 32], sizes = [8, 32], strides = [1, 1]} : vector<8x64xf32> to vector<8x32xf32>
    %8 = arith.negf %7 : vector<8x32xf32>
    %9 = math.exp %8 : vector<8x32xf32>
    %cst_5 = arith.constant 1.000000e+00 : f32
    %10 = vector.broadcast %cst_5 : f32 to vector<8x32xf32>
    %11 = arith.addf %10, %9 : vector<8x32xf32>
    %12 = arith.divf %10, %11 : vector<8x32xf32>
    %13 = arith.mulf %6, %12 : vector<8x32xf32>
    %c0_6 = arith.constant 0 : index
    %c0_7 = arith.constant 0 : index
    %14 = vector.load %arg4[%c0_6, %c0_7] : memref<32x64xf32, #tpu.memory_space<vmem>>, vector<32x64xf32>
    %cst_8 = arith.constant dense<0.000000e+00> : vector<8x64xf32>
    %15 = tpu.matmul %13, %14, %cst_8 {dimension_numbers = #tpu.dot_dimension_numbers<[1], [0], [0], [1], [0, 0, 1, 1], [], []>} : vector<8x32xf32>, vector<32x64xf32>, vector<8x64xf32> -> vector<8x64xf32>
    %c0_9 = arith.constant 0 : index
    %c0_10 = arith.constant 0 : index
    %16 = vector.load %arg5[%c0_9, %c0_10] : memref<1x64xf32, #tpu.memory_space<vmem>>, vector<1x64xf32>
    %17 = vector.broadcast %16 : vector<1x64xf32> to vector<8x64xf32>
    %18 = arith.addf %15, %17 : vector<8x64xf32>
    %19 = vector.extract_strided_slice %18 {offsets = [0, 0], sizes = [8, 32], strides = [1, 1]} : vector<8x64xf32> to vector<8x32xf32>
    %20 = vector.extract_strided_slice %18 {offsets = [0, 32], sizes = [8, 32], strides = [1, 1]} : vector<8x64xf32> to vector<8x32xf32>
    %21 = arith.negf %20 : vector<8x32xf32>
    %22 = math.exp %21 : vector<8x32xf32>
    %cst_11 = arith.constant 1.000000e+00 : f32
    %23 = vector.broadcast %cst_11 : f32 to vector<8x32xf32>
    %24 = arith.addf %23, %22 : vector<8x32xf32>
    %25 = arith.divf %23, %24 : vector<8x32xf32>
    %26 = arith.mulf %19, %25 : vector<8x32xf32>
    %c0_12 = arith.constant 0 : index
    %c0_13 = arith.constant 0 : index
    %27 = vector.load %arg6[%c0_12, %c0_13] : memref<32x16xf32, #tpu.memory_space<vmem>>, vector<32x16xf32>
    %cst_14 = arith.constant dense<0.000000e+00> : vector<8x16xf32>
    %28 = tpu.matmul %26, %27, %cst_14 {dimension_numbers = #tpu.dot_dimension_numbers<[1], [0], [0], [1], [0, 0, 1, 1], [], []>} : vector<8x32xf32>, vector<32x16xf32>, vector<8x16xf32> -> vector<8x16xf32>
    %c0_15 = arith.constant 0 : index
    %c0_16 = arith.constant 0 : index
    %29 = vector.load %arg7[%c0_15, %c0_16] : memref<1x16xf32, #tpu.memory_space<vmem>>, vector<1x16xf32>
    %30 = vector.broadcast %29 : vector<1x16xf32> to vector<8x16xf32>
    %31 = arith.addf %28, %30 : vector<8x16xf32>
    %c0_17 = arith.constant 0 : index
    %c0_18 = arith.constant 0 : index
    %32 = vector.load %arg8[%c0_17, %c0_18] : memref<8x16xf32, #tpu.memory_space<vmem>>, vector<8x16xf32>
    tpu.vector_store %arg8[%c0_17, %c0_18], %31 {strides = array<i32>} : memref<8x16xf32, #tpu.memory_space<vmem>>, vector<8x16xf32>,
    return
  }
  func.func @transform_0(%arg0: i32) -> (i32, i32) {
    %c0_i32 = arith.constant 0 : i32
    %c0_i32_0 = arith.constant 0 : i32
    return %arg0, %c0_i32 : i32, i32
  }
  func.func @transform_1(%arg0: i32) -> (i32, i32) {
    %c0_i32 = arith.constant 0 : i32
    %c0_i32_0 = arith.constant 0 : i32
    %c0_i32_1 = arith.constant 0 : i32
    return %c0_i32, %c0_i32_0 : i32, i32
  }
  func.func @transform_2(%arg0: i32) -> (i32, i32) {
    %c0_i32 = arith.constant 0 : i32
    %c0_i32_0 = arith.constant 0 : i32
    %c0_i32_1 = arith.constant 0 : i32
    return %c0_i32, %c0_i32_0 : i32, i32
  }
  func.func @transform_3(%arg0: i32) -> (i32, i32) {
    %c0_i32 = arith.constant 0 : i32
    %c0_i32_0 = arith.constant 0 : i32
    %c0_i32_1 = arith.constant 0 : i32
    return %c0_i32, %c0_i32_0 : i32, i32
  }
  func.func @transform_4(%arg0: i32) -> (i32, i32) {
    %c0_i32 = arith.constant 0 : i32
    %c0_i32_0 = arith.constant 0 : i32
    %c0_i32_1 = arith.constant 0 : i32
    return %c0_i32, %c0_i32_0 : i32, i32
  }
  func.func @transform_5(%arg0: i32) -> (i32, i32) {
    %c0_i32 = arith.constant 0 : i32
    %c0_i32_0 = arith.constant 0 : i32
    %c0_i32_1 = arith.constant 0 : i32
    return %c0_i32, %c0_i32_0 : i32, i32
  }
  func.func @transform_6(%arg0: i32) -> (i32, i32) {
    %c0_i32 = arith.constant 0 : i32
    %c0_i32_0 = arith.constant 0 : i32
    %c0_i32_1 = arith.constant 0 : i32
    return %c0_i32, %c0_i32_0 : i32, i32
  }
  func.func @transform_7(%arg0: i32) -> (i32, i32) {
    %c0_i32 = arith.constant 0 : i32
    %c0_i32_0 = arith.constant 0 : i32
    return %arg0, %c0_i32 : i32, i32
  }
}

</mosaic_0001>

<bundles_post_ra>
// kernel: tpu_custom_call.1
= control target key start
LH: loop header
LB: loop body
LE: loop exit
PB: predicated region body
PF: predicated region fallthrough
CT: control target
= control target key end

     0   :  { %12 = vsyncpa [#allocation3], 0  ;;  %s878_s0 = inlined_call_operand.vmem [shape: f32[16,16], index: 0, kind: input, shape index: {}]   ;;  %s879_s1 = inlined_call_operand.hbm [shape: f32[16,64], index: 1, kind: input, shape index: {}]   ;;  %s880_s2 = inlined_call_operand.vmem [shape: f32[1,64], index: 2, kind: input, shape index: {}]   ;;  %s881_s3 = inlined_call_operand.vmem [shape: f32[32,64], index: 3, kind: input, shape index: {}]   ;;  %s882_s4 = inlined_call_operand.vmem [shape: f32[1,64], index: 4, kind: input, shape index: {}]   ;;  %s883_s5 = inlined_call_operand.vmem [shape: f32[32,16], index: 5, kind: input, shape index: {}]   ;;  %s884_s6 = inlined_call_operand.vmem [shape: f32[1,16], index: 6, kind: input, shape index: {}]   ;;  %s885_s7 = inlined_call_operand.hbm [shape: f32[16,16], index: 7, kind: output, shape index: {}]  }
   0x1   :  { %13 = vsyncpa [#allocation4], 0 }
   0x2   :  { %15 = vsyncpa [#allocation4 + $0x1], 0  ;;  %s744_s24 = smov 0   ;;  %s746_s25 = smov 0  }
   0x3   :  { %s748_s26 = smov 0   ;;  %s750_s27 = smov 0  }
   0x4 LB: > { %s765_s28 = sadd.s32 4294967295, %s698_s27   ;;  %s521_s29 = sadd.s32 4294967294, %s698_s27   ;;  %s698_s27 = sphi %s750_s27, %s891_s27   ;;  %s694_s26 = sphi %s748_s26, %s890_s26   ;;  %s690_s25 = sphi %s746_s25, %s889_s25   ;;  %s686_s24 = sphi %s744_s24, %s888_s24  }
   0x5   : > { %s769_s30 = sadd.s32 1, %s698_s27   ;;  %s180_s8 = sadd.s32 1, %s694_s26 }
   0x6   : > { %s177_s9 = ssub.s32 %s698_s27, %s769_s30  ;;  %p190_p0 = scmp.ne.s32.totalorder %s694_s26, %s690_s25 }
   0x7   : > { %p178_p1 = scmp.eq.s32.totalorder %s177_s9, 0  ;;  %p191_p2 = scmp.eq.s32.totalorder %s765_s28, 1 }
   0x8   : > { %p196_p3 = scmp.ne.s32.totalorder %s690_s25, %s686_s24  ;;  %p197_p4 = scmp.eq.s32.totalorder %s521_s29, 1 }
   0x9   : > { %s780_s10 = scalar_select %p178_p1, %s694_s26, %s180_s8  }
   0xa   : > { %p782_p5 = por %p191_p2, %p190_p0  ;;  %p786_p6 = por %p197_p4, %p196_p3 }
   0xb   : > { %p522_p7 = scmp.ge.s32.totalorder %s698_s27, 1  ;;  %p204_p8 = scmp.lt.s32.totalorder %s698_s27, 3 }
   0xc   : > { %p552_p9 = scmp.eq.s32.totalorder %s765_s28, 0  ;;  %s215_s15 = sshll.u32 %s879_s1, 4  ;;  %s216_s15 = int_to_ptr.hbm [resolvable:$true] %s215_s15 }
   0xd   : > { %p205_p10 = pnand %p522_p7, %p204_p8  ;;  %s700_s16 = smov [#allocation2]  }
   0xe   : > { %s217_s17 = sshll.u32 %s700_s16, 4  ;;  %s701_s18 = smov 128   ;;  %s218_s17 = int_to_ptr.vmem [resolvable:$true] %s217_s17 }
   0xf   : > { %p544_p11 = pneg %p205_p10  ;;  %s702_s19 = smov 8  }
  0x10   : > { %255 = sbr.rel (%p205_p10) target bundleno = 712 (0x2c8), region = 48 }
  0x11   : > { %p545_p12 = pnand %p552_p9, %p544_p11 }
  0x13   : > { %547 = dma.hbm_to_vmem [thread:$0]  (!%p545_p12), %s216_s15, 256, %s218_s17, [#allocation3], %s701_s18, %s701_s18, %s702_s19  }
  0x15   : > { %677 = dma.done.wait (%p552_p9), [#allocation3], 256  }
  0x16   : > { %679 = vsyncadd (%p552_p9), [#allocation3], 4294967040  ;;  %p287_p13 = scmp.lt.s32.totalorder %s765_s28, 1  ;;  %v293_v0 = vld [vmem:[#allocation2 + $0x8] sm:$0xff]  ;;  %v292_v1 = vld [vmem:[#allocation2] sm:$0xff]  ;;  %vm298_vm0 = vcmask 130048  }
  0x17   : > { %316 = vmatpush.msra.mxu0 %v293_v0  ;;  %v591_v3 = vld [vmem:[%s880_s2] ss:$0 sm:$0xff]  ;;  %v349_v4 = vld [vmem:[%s881_s3 + $0x18] sm:$0xff]  ;;  %v348_v5 = vld [vmem:[%s881_s3 + $0x10] sm:$0xff]  ;;  %s703_s19 = smov 96   ;;  %vm354_vm5 = vcmask 261120  }
  0x18   : > { %s288_s20 = scalar_select %p287_p13, %s765_s28, 1  ;;  %370 = vmatpush.msra.mxu1 %v349_v4  ;;  %v347_v8 = vld [vmem:[%s881_s3 + $0x8] sm:$0xff]  ;;  %v346_v22 = vld [vmem:[%s881_s3] sm:$0xff]  ;;  %v405_v26 = vld [vmem:[%s883_s5 + $0x18] sm:$0xff] }
  0x19   : > { %317 = vmatpush.msra.mxu0 %v292_v1  ;;  %v592_v25 = vld [vmem:[%s882_s4] ss:$0 sm:$0xff]  ;;  %v404_v27 = vld [vmem:[%s883_s5 + $0x10] sm:$0xff]  ;;  %425 = vmatpush.msra.mxu2 %v405_v26  ;;  %v403_v30 = vld [vmem:[%s883_s5 + $0x8] sm:$0xff]  ;;  %s284_s18 = sand.u32 1, %s690_s25  }
  0x1a   : > { %s528_s21 = sshll.u32 %s288_s20, 3  ;;  %371 = vmatpush.msra.mxu1 %v348_v5  ;;  %v402_v44 = vld [vmem:[%s883_s5] sm:$0xff]  ;;  %s527_s20 = sshll.u32 %s284_s18, 3 }
  0x1b   : > { %s290_s29 = scalar_lea.vmem %s878_s0, %s528_s21  ;;  %426 = vmatpush.msra.mxu2 %v404_v27  ;;  %s535_s21 = sshll.u32 %s765_s28, 3  ;;  %v593_v47 = vld [vmem:[%s884_s6] ss:$0 sm:$0xff] }
  0x1c   : > { %v291_v2 = vld [vmem:[%s290_s29] sm:$0xff]  ;;  %372 = vmatpush.msra.mxu1 %v347_v8  ;;  %s445_s29 = scalar_lea.hbm %s885_s7, %s535_s21  ;;  %s435_s15 = scalar_lea.sflag [#allocation4], %s284_s18 }
  0x1d   : > { %529 = vmatmul.msk.f32.vlgmr.msra.gmra.mxu0 %vm298_vm0, %v291_v2  ;;  %427 = vmatpush.msra.mxu2 %v403_v30  ;;  %s449_s14 = sshll.u32 %s445_s29, 4  ;;  %s450_s14 = int_to_ptr.hbm [resolvable:$true] %s449_s14 }
  0x1e   : > { %373 = vmatpush.msra.mxu1 %v346_v22  ;;  %s646_s28 = sshra.s32 %s450_s14, 4  ;;  %s647_s28 = int_to_ptr.hbm [resolvable:$true] %s646_s28 }
  0x1f   : > { %428 = vmatpush.msra.mxu2 %v402_v44  ;;  %s648_s16 = scalar_lea.hbm %s647_s28, 8  ;;  %p653_p3 = scmp.lt.s32.totalorder %s647_s28, %s885_s7 }
  0x20   : > { %p649_p0 = scmp.ne.s32.totalorder %s647_s28, %s648_s16 }
  0x22   : > { %p650_p1 = pnand %p649_p0, %p782_p5 }
  0x24   : > { %p651_p2 = pneg %p650_p1 }
  0x9a   : > { %v319_v6 = vpop.f32.mrf.mxu0 }
  0x9b   : > { %v320_v7 = vadd.f32 %v591_v3, %v319_v6 }
  0x9d   : > { %v530_v9 = vmul.f32 -1.442695, %v320_v7 }
  0x9f   : > { %594 = vpow2.f32 %v530_v9 }
  0xa5   : > { %v595_v10 = vpop.eup %594 }
  0xa6   : > { %v325_v11 = vadd.f32 1.0, %v595_v10 }
  0xa8   : > { %596 = vrcp.f32 %v325_v11  ;;  %v337_v15 = vand.u32 2147483648, %v325_v11  ;;  %v335_v17 = vand.u32 2147483647, %v325_v11  ;;  %vm331_vm2 = vweird.f32 %v325_v11 }
  0xaa   : > { %v338_v19 = vor.u32 1.1754944e-38, %v337_v15  ;;  %vm336_vm4 = vcmp.eq.f32.partialorder %v335_v17, 8.507059e+37 }
  0xae   : > { %v597_v12 = vpop.eup %596 }
  0xaf   : > { %v327_v13 = vmul.f32 %v597_v12, %v325_v11  ;;  %vm332_vm1 = vweird.f32 %v597_v12 }
  0xb0   : > { %vm333_vm3 = vmor %vm331_vm2, %vm332_vm1 }
  0xb1   : > { %v328_v14 = vsub.f32 1.0, %v327_v13 }
  0xb3   : > { %v329_v16 = vmul.f32 %v597_v12, %v328_v14 }
  0xb5   : > { %v330_v18 = vadd.f32 %v597_v12, %v329_v16 }
  0xb7   : > { %v334_v20 = vsel %vm333_vm3, %v597_v12, %v330_v18 }
  0xb8   : > { %v339_v21 = vsel %vm336_vm4, %v338_v19, %v334_v20 }
  0xb9   : > { %342 = vrot.lane.b32.xlu0 %v339_v21, %s703_s19 }
 0x12b   : > { %v343_v23 = vpop.permute.xlu0 %342 }
 0x12c   : > { %v345_v24 = vmul.f32 %v343_v23, %v320_v7 }
 0x12e   : > { %531 = vmatmul.msk.f32.vlgmr.msra.gmra.mxu1 %vm354_vm5, %v345_v24 }
 0x1ab   : > { %v375_v28 = vpop.f32.mrf.mxu1 }
 0x1ac   : > { %v376_v29 = vadd.f32 %v592_v25, %v375_v28 }
 0x1ae   : > { %v532_v31 = vmul.f32 -1.442695, %v376_v29 }
 0x1b0   : > { %598 = vpow2.f32 %v532_v31 }
 0x1b6   : > { %v599_v32 = vpop.eup %598 }
 0x1b7   : > { %v381_v33 = vadd.f32 1.0, %v599_v32 }
 0x1b9   : > { %600 = vrcp.f32 %v381_v33  ;;  %v393_v37 = vand.u32 2147483648, %v381_v33  ;;  %v391_v39 = vand.u32 2147483647, %v381_v33  ;;  %vm387_vm7 = vweird.f32 %v381_v33 }
 0x1bb   : > { %v394_v41 = vor.u32 1.1754944e-38, %v393_v37  ;;  %vm392_vm9 = vcmp.eq.f32.partialorder %v391_v39, 8.507059e+37 }
 0x1bf   : > { %v601_v34 = vpop.eup %600 }
 0x1c0   : > { %v383_v35 = vmul.f32 %v601_v34, %v381_v33  ;;  %vm388_vm6 = vweird.f32 %v601_v34 }
 0x1c1   : > { %vm389_vm8 = vmor %vm387_vm7, %vm388_vm6 }
 0x1c2   : > { %v384_v36 = vsub.f32 1.0, %v383_v35 }
 0x1c4   : > { %v385_v38 = vmul.f32 %v601_v34, %v384_v36 }
 0x1c6   : > { %v386_v40 = vadd.f32 %v601_v34, %v385_v38 }
 0x1c8   : > { %v390_v42 = vsel %vm389_vm8, %v601_v34, %v386_v40 }
 0x1c9   : > { %v395_v43 = vsel %vm392_vm9, %v394_v41, %v390_v42 }
 0x1ca   : > { %398 = vrot.lane.b32.xlu0 %v395_v43, %s703_s19  ;;  %s286_s19 = scalar_lea.vmem [#allocation5], %s527_s20  ;;  %s652_s20 = scalar_lea.hbm %s885_s7, 16 }
 0x1cb   : > { %s447_s13 = sshll.u32 %s286_s19, 4  ;;  %p654_p4 = scmp.lt.s32.totalorder %s652_s20, %s648_s16  ;;  %s448_s13 = int_to_ptr.vmem [resolvable:$true] %s447_s13 }
 0x1cd   : > { %p655_p7 = por %p654_p4, %p653_p3 }
 0x1cf   : > { %p656_p8 = pnand %p655_p7, %p651_p2 }
 0x23c   : > { %v399_v45 = vpop.permute.xlu0 %398 }
 0x23d   : > { %v401_v46 = vmul.f32 %v399_v45, %v376_v29 }
 0x23f   : > { %533 = vmatmul.msk.f32.vlgmr.msra.gmra.mxu2 %vm354_vm5, %v401_v46 }
 0x2c2   : > { %v430_v48 = vpop.f32.mrf.mxu2 }
 0x2c3   : > { %v431_v49 = vadd.f32 %v593_v47, %v430_v48 }
 0x2c5   : > { %433 = vst.msk [vmem:[%s286_s19] sm:$0xff] %vm298_vm0, %v431_v49 }
 0x2c6   : > { %659 = shalt.err (!%p656_p8)
}
 0x2c7   : > { %542 = dma.vmem_to_hbm [thread:$0]  (%p782_p5), %s448_s13, 128, %s450_s14, %s435_s15  }
 0x2c8 PF: > { %p554_p9 = scmp.ge.s32.totalorder %s698_s27, 2  ;;  %s461_s18 = sand.u32 1, %s686_s24  }
 0x2c9   : > { %s462_s29 = scalar_lea.sflag [#allocation4], %s461_s18 }
 0x2ca   : > { %p549_p10 = pnand %p554_p9, %p786_p6 }
 0x2cc   : > { %p550_p11 = pneg %p549_p10 }
 0x2ce   : > { %681 = dma.done.wait (%p550_p11), %s462_s29, 128  }
 0x2cf   : > { %683 = vsyncadd (%p550_p11), %s462_s29, 4294967168  ;;  %p18_p12 = scmp.ge.s32.totalorder %s769_s30, 4   ;;  %s888_s24 = smov %s690_s25 }
 0x2d0   : > { %s889_s25 = smov %s694_s26  ;;  %s890_s26 = smov %s780_s10 }
 0x2d1   : > { %s891_s27 = smov %s769_s30  ;;  %20 = sbr.rel (!%p18_p12) target bundleno = 4 (0x4), region = 88 }
 0x2d6   :  { %468 = vsyncpa [#allocation3], 1 }
 0x2d7   :  { %470 = vsyncpa [#allocation3 + $0x1], 1 }
 0x2d8   :  { %471 = vsyncpa [#allocation4], 1 }
 0x2d9   :  { %473 = vsyncpa [#allocation4 + $0x1], 1 }

</bundles_post_ra>
